<compile_context>
chip_gen: v5e
topology: v5e:2x2
jax: 0.10.0
libtpu: 0.0.40
codegen_flags: <defaults>
</compile_context>

<pallas_src>
import functools

import jax
import jax.numpy as jnp
from jax.experimental import pallas as pl
from jax.experimental.pallas import tpu as pltpu

_LANES = 128
_TARGET_BLOCK_BYTES = 4 * 1024 * 1024   # ~4 MiB/block: on the HBM-roofline plateau
_VMEM_LIMIT_BYTES = 32 * 1024 * 1024    # lift v5e's 16 MiB default; == v6e/v7x default
_TINY_BYTES = 256 * 1024                # below this, fused XLA elementwise wins


def _modified_leaky_relu_kernel(x_ref, o_ref, *, alpha, inv_alpha):
    x = x_ref[...]
    # where(x >= 0, alpha, 1/alpha) * x  ==  alpha*max(0,x) + (1/alpha)*min(0,x)
    scale = jnp.where(x >= 0, alpha, inv_alpha)
    o_ref[...] = (x * scale).astype(o_ref.dtype)


def _xla_modified_leaky_relu(x, alpha, inv_alpha):
    return (jnp.where(x >= 0, alpha, inv_alpha) * x).astype(x.dtype)


def _round_up(v, m):
    return ((v + m - 1) // m) * m


def _choose_block_rows(rows, itemsize):
    # Packed-tile sublane multiple: f32 -> 8, bf16/f16 -> 16, int8/fp8 -> 32.
    sublane = max(8, 32 // itemsize)
    target = (_TARGET_BLOCK_BYTES // (_LANES * itemsize)) // sublane * sublane
    target = max(sublane, target)
    if rows >= 2 * sublane:
        # Ensure >= 2 grid steps on medium inputs so the "parallel" row axis
        # can be sharded across v7x's two TensorCores.
        half = _round_up(pl.cdiv(rows, 2), sublane)
        return min(target, half)
    return sublane


def _pallas_2d(x2d, alpha, inv_alpha, block_rows, donate):
    rows = x2d.shape[0]
    kernel = functools.partial(
        _modified_leaky_relu_kernel, alpha=alpha, inv_alpha=inv_alpha
    )
    return pl.pallas_call(
        kernel,
        out_shape=jax.ShapeDtypeStruct(x2d.shape, x2d.dtype),
        grid_spec=pl.GridSpec(
            # cdiv grid: the ragged final row-block (if any) is masked by
            # Pallas -- no host-side padding / slicing of the full tensor.
            grid=(pl.cdiv(rows, block_rows),),
            in_specs=[pl.BlockSpec((block_rows, _LANES), lambda i: (i, 0))],
            out_specs=pl.BlockSpec((block_rows, _LANES), lambda i: (i, 0)),
        ),
        compiler_params=pltpu.CompilerParams(
            dimension_semantics=("parallel",),
            vmem_limit_bytes=_VMEM_LIMIT_BYTES,
        ),
        input_output_aliases={0: 0} if donate else {},
    )(x2d)


def modified_leaky_relu(
    x: jax.Array,
    alpha: float = 0.5,
    *,
    min_pallas_bytes: int = _TINY_BYTES,
    donate: bool = False,
) -> jax.Array:
    """Elementwise alpha * max(0, x) + (1/alpha) * min(0, x)."""
    if alpha == 0:
        raise ValueError("alpha must be nonzero (1/alpha would be inf)")
    alpha = float(alpha)
    inv_alpha = 1.0 / alpha

    orig_shape = x.shape
    n = int(x.size)
    if n == 0:
        return x

    itemsize = jnp.dtype(x.dtype).itemsize
    rows = n // _LANES
    tail = n - rows * _LANES

    # Tiny inputs (or inputs smaller than one 128-lane row): launch overhead
    # and layout plumbing dominate; a fused XLA elementwise is strictly faster.
    if rows == 0 or n * itemsize < min_pallas_bytes:
        return _xla_modified_leaky_relu(x, alpha, inv_alpha)

    x_flat = x.reshape(-1)
    if tail == 0:
        x_main = x_flat.reshape(rows, _LANES)
    else:
        x_main = x_flat[: rows * _LANES].reshape(rows, _LANES)

    block_rows = _choose_block_rows(rows, itemsize)
    out_main = _pallas_2d(
        x_main, alpha, inv_alpha, block_rows, donate and tail == 0
    )

    out_flat = out_main.reshape(-1)
    if tail:
        # Rare sub-128-element tail: handled with a tiny fused XLA elementwise
        # instead of padding / copying the whole tensor through HBM.
        out_tail = _xla_modified_leaky_relu(
            x_flat[rows * _LANES:], alpha, inv_alpha
        )
        out_flat = jnp.concatenate([out_flat, out_tail])
    return out_flat.reshape(orig_shape)


def _reference(x, alpha=0.5):
    zero = jnp.zeros_like(x)
    return alpha * jnp.maximum(zero, x) + (1.0 / alpha) * jnp.minimum(zero, x)


if __name__ == "__main__":
    key = jax.random.PRNGKey(0)
    # NCHW activations, small shapes: batch=2, channels=4, spatial=16x16.
    x = jax.random.normal(key, (2, 4, 16, 16), dtype=jnp.float32)

    # Force the Pallas path even at this small size (the default wrapper would
    # take the tiny-input XLA fast path).
    out = modified_leaky_relu(x, alpha=0.5, min_pallas_bytes=0)
    out = jax.block_until_ready(out)
    ref = _reference(x, alpha=0.5)
    assert out.shape == x.shape and out.dtype == x.dtype
    assert jnp.allclose(out, ref, atol=1e-6, rtol=1e-6), "mismatch vs reference"

    # Ragged case (n % 128 != 0): masked final row-block + tiny XLA tail.
    x2 = jax.random.normal(jax.random.PRNGKey(1), (300, 70), dtype=jnp.float32)
    out2 = jax.block_until_ready(
        modified_leaky_relu(x2, alpha=0.5, min_pallas_bytes=0)
    )
    assert jnp.allclose(out2, _reference(x2, 0.5), atol=1e-6, rtol=1e-6)

    # bf16 case (dtype-aware sublane rounding = 16, byte-sized blocks).
    x3 = jax.random.normal(jax.random.PRNGKey(2), (4, 256, 128), dtype=jnp.bfloat16)
    out3 = jax.block_until_ready(
        modified_leaky_relu(x3, alpha=0.5, min_pallas_bytes=0)
    )
    assert out3.dtype == x3.dtype
    assert jnp.allclose(
        out3.astype(jnp.float32),
        _reference(x3.astype(jnp.float32), 0.5),
        atol=1e-2, rtol=1e-2,
    )

    # Default wrapper (tiny-input XLA fast path) still matches.
    out4 = jax.block_until_ready(modified_leaky_relu(x, alpha=0.5))
    assert jnp.allclose(out4, ref, atol=1e-6, rtol=1e-6)

    print("KERNEL_OK")
</pallas_src>

<mosaic_0001>
module attributes {stable_mosaic.version = 11 : i64} {
  func.func @_modified_leaky_relu_kernel(%arg0: i32, %arg1: memref<8x128xf32, #tpu.memory_space<vmem>>, %arg2: memref<8x128xf32, #tpu.memory_space<vmem>>) attributes {dimension_semantics = [#tpu.dimension_semantics<parallel>], iteration_bounds = array<i64: 2>, scalar_prefetch = 0 : i64, scratch_operands = 0 : i64, tpu.core_type = #tpu.core_type<tc>, window_params = [{transform_indices = @transform_0, window_bounds = array<i64: 8, 128>}, {transform_indices = @transform_1, window_bounds = array<i64: 8, 128>}]} {
    %c0 = arith.constant 0 : index
    %c0_0 = arith.constant 0 : index
    %0 = vector.load %arg1[%c0, %c0_0] : memref<8x128xf32, #tpu.memory_space<vmem>>, vector<8x128xf32>
    %cst = arith.constant 0.000000e+00 : f32
    %1 = vector.broadcast %cst : f32 to vector<8x128xf32>
    %2 = arith.cmpf oge, %0, %1 : vector<8x128xf32>
    %cst_1 = arith.constant 5.000000e-01 : f32
    %cst_2 = arith.constant 2.000000e+00 : f32
    %3 = vector.broadcast %cst_1 : f32 to vector<8x128xf32>
    %4 = vector.broadcast %cst_2 : f32 to vector<8x128xf32>
    %5 = arith.select %2, %3, %4 : vector<8x128xi1>, vector<8x128xf32>
    %6 = arith.mulf %0, %5 : vector<8x128xf32>
    %c0_3 = arith.constant 0 : index
    %c0_4 = arith.constant 0 : index
    %7 = vector.load %arg2[%c0_3, %c0_4] : memref<8x128xf32, #tpu.memory_space<vmem>>, vector<8x128xf32>
    tpu.vector_store %arg2[%c0_3, %c0_4], %6 {strides = array<i32>} : memref<8x128xf32, #tpu.memory_space<vmem>>, vector<8x128xf32>,
    return
  }
  func.func @transform_0(%arg0: i32) -> (i32, i32) {
    %c0_i32 = arith.constant 0 : i32
    %c0_i32_0 = arith.constant 0 : i32
    return %arg0, %c0_i32 : i32, i32
  }
  func.func @transform_1(%arg0: i32) -> (i32, i32) {
    %c0_i32 = arith.constant 0 : i32
    %c0_i32_0 = arith.constant 0 : i32
    return %arg0, %c0_i32 : i32, i32
  }
}

</mosaic_0001>

<bundles_post_ra>
// kernel: tpu_custom_call.1
= control target key start
LH: loop header
LB: loop body
LE: loop exit
PB: predicated region body
PF: predicated region fallthrough
CT: control target
= control target key end

     0   :  { %6 = vsyncpa [#allocation3], 0  ;;  %s520_s0 = inlined_call_operand.hbm [shape: f32[16,128], index: 0, kind: input, shape index: {}]   ;;  %s521_s1 = inlined_call_operand.hbm [shape: f32[16,128], index: 1, kind: output, shape index: {}]  }
   0x1   :  { %8 = vsyncpa [#allocation3 + $0x1], 0 }
   0x2   :  { %9 = vsyncpa [#allocation4], 0 }
   0x3   :  { %11 = vsyncpa [#allocation4 + $0x1], 0  ;;  %s393_s6 = smov 0   ;;  %s395_s7 = smov 0  }
   0x4   :  { %s397_s8 = smov 0   ;;  %s399_s9 = smov 0  }
   0x5 LB: > { %s414_s10 = sadd.s32 4294967295, %s380_s9   ;;  %s225_s11 = sadd.s32 4294967294, %s380_s9   ;;  %s380_s9 = sphi %s399_s9, %s531_s9   ;;  %s376_s8 = sphi %s397_s8, %s530_s8   ;;  %s372_s7 = sphi %s395_s7, %s529_s7   ;;  %s368_s6 = sphi %s393_s6, %s528_s6  }
   0x6   : > { %s418_s12 = sadd.s32 1, %s380_s9   ;;  %s24_s13 = sadd.s32 1, %s376_s8 }
   0x7   : > { %s21_s14 = ssub.s32 %s380_s9, %s418_s12  ;;  %p31_p0 = scmp.ne.s32.totalorder %s376_s8, %s372_s7 }
   0x8   : > { %p22_p1 = scmp.eq.s32.totalorder %s21_s14, 0  ;;  %p32_p2 = scmp.eq.s32.totalorder %s380_s9, 0 }
   0x9   : > { %p37_p3 = scmp.ne.s32.totalorder %s372_s7, %s368_s6  ;;  %p38_p4 = scmp.eq.s32.totalorder %s414_s10, 0 }
   0xa   : > { %s430_s15 = scalar_select %p22_p1, %s376_s8, %s24_s13  }
   0xb   : > { %p432_p5 = por %p32_p2, %p31_p0  ;;  %p436_p6 = por %p38_p4, %p37_p3 }
   0xc   : > { %p61_p7 = scmp.eq.s32.totalorder %s414_s10, 1  ;;  %p67_p8 = scmp.eq.s32.totalorder %s225_s11, 1 }
   0xd   : > { %p249_p10 = scmp.lt.s32.totalorder %s380_s9, 2  ;;  %s87_s20 = sand.u32 1, %s376_s8  }
   0xe   : > { %p443_p11 = por %p61_p7, %p31_p0  ;;  %p447_p12 = por %p67_p8, %p37_p3 }
   0xf   : > { %s229_s21 = sshll.u32 %s380_s9, 3  ;;  %s228_s22 = sshll.u32 %s87_s20, 3 }
  0x10   : > { %s95_s25 = scalar_lea.hbm %s520_s0, %s229_s21  ;;  %s91_s27 = scalar_lea.vmem [#allocation2], %s228_s22 }
  0x11   : > { %s97_s26 = sshll.u32 %s95_s25, 4  ;;  %s99_s28 = sshll.u32 %s91_s27, 4  ;;  %s98_s26 = int_to_ptr.hbm [resolvable:$true] %s97_s26  ;;  %s100_s28 = int_to_ptr.vmem [resolvable:$true] %s99_s28 }
  0x12   : > { %p458_p13 = pnand %p249_p10, %p432_p5  ;;  %p230_p0 = scmp.ge.s32.totalorder %s380_s9, 1 }
  0x13   : > { %p104_p1 = scmp.lt.s32.totalorder %s380_s9, 3  ;;  %s88_s30 = scalar_lea.sflag [#allocation3], %s87_s20 }
  0x14   : > { %s284_s2 = sshra.s32 %s98_s26, 4  ;;  %p288_p3 = pneg %p458_p13  ;;  %s285_s2 = int_to_ptr.hbm [resolvable:$true] %s284_s2 }
  0x15   : > { %s286_s3 = scalar_lea.hbm %s285_s2, 8  ;;  %s291_s11 = scalar_lea.hbm %s520_s0, 16 }
  0x16   : > { %p287_p2 = scmp.ne.s32.totalorder %s285_s2, %s286_s3  ;;  %p292_p5 = scmp.lt.s32.totalorder %s285_s2, %s520_s0 }
  0x17   : > { %p293_p8 = scmp.lt.s32.totalorder %s291_s11, %s286_s3 }
  0x18   : > { %p289_p4 = pnand %p288_p3, %p287_p2 }
  0x19   : > { %p294_p10 = por %p293_p8, %p292_p5 }
  0x1a   : > { %p290_p7 = pneg %p289_p4 }
  0x1c   : > { %p295_p9 = pnand %p294_p10, %p290_p7 }
  0x1e   : > { %298 = shalt.err (!%p295_p9)
}
  0x1f   : > { %244 = dma.hbm_to_vmem [thread:$0]  (!%p458_p13), %s98_s26, 128, %s100_s28, %s88_s30  }
  0x20   : > { %p105_p2 = pnand %p230_p0, %p104_p1 }
  0x21   : > { %s479_s16 = sand.u32 (!%p105_p2), 1, %s372_s7  }
  0x22   : > { %108 = sbr.rel (%p105_p2) target bundleno = 55 (0x37), region = 24  ;;  %s231_s20 = sshll.u32 (!%p105_p2), %s479_s16, 3 }
  0x23   : > { %s111_s21 = scalar_lea.sflag (!%p105_p2), [#allocation3], %s479_s16  ;;  %s114_s22 = scalar_lea.vmem (!%p105_p2), [#allocation2], %s231_s20 }
  0x27   : > { %359 = dma.done.wait (%p436_p6), %s111_s21, 128  }
  0x28   : > { %361 = vsyncadd (%p436_p6), %s111_s21, 4294967168  ;;  %s234_s23 = sshll.u32 %s414_s10, 3  ;;  %v134_v0 = vld [vmem:[%s114_s22] sm:$0xff]  ;;  %s133_s27 = scalar_lea.vmem [#allocation5], %s231_s20  ;;  %v382_v1 = vmov 2.0  }
  0x29   : > { %s150_s26 = scalar_lea.hbm %s521_s1, %s234_s23  ;;  %s152_s28 = sshll.u32 %s133_s27, 4  ;;  %vm135_vm0 = vcmp.ge.f32.partialorder %v134_v0, 0.0  ;;  %s153_s28 = int_to_ptr.vmem [resolvable:$true] %s152_s28 }
  0x2a   : > { %s154_s29 = sshll.u32 %s150_s26, 4  ;;  %v136_v2 = vsel %vm135_vm0, 0.5, %v382_v1  ;;  %s140_s17 = scalar_lea.sflag [#allocation4], %s479_s16  ;;  %s155_s29 = int_to_ptr.hbm [resolvable:$true] %s154_s29 }
  0x2b   : > { %v137_v3 = vmul.f32 %v136_v2, %v134_v0  ;;  %s328_s30 = sshra.s32 %s155_s29, 4  ;;  %s334_s4 = scalar_lea.hbm %s521_s1, 16  ;;  %s329_s30 = int_to_ptr.hbm [resolvable:$true] %s328_s30 }
  0x2c   : > { %s330_s10 = scalar_lea.hbm %s329_s30, 8  ;;  %p335_p0 = scmp.lt.s32.totalorder %s329_s30, %s521_s1 }
  0x2d   : > { %138 = vst [vmem:[%s133_s27] sm:$0xff] %v137_v3  ;;  %p331_p6 = scmp.ne.s32.totalorder %s329_s30, %s330_s10  ;;  %p336_p1 = scmp.lt.s32.totalorder %s334_s4, %s330_s10 }
  0x2f   : > { %p332_p9 = pnand %p331_p6, %p443_p11  ;;  %p337_p3 = por %p336_p1, %p335_p0 }
  0x31   : > { %p333_p13 = pneg %p332_p9 }
  0x33   : > { %p338_p4 = pnand %p337_p3, %p333_p13 }
  0x35   : > { %341 = shalt.err (!%p338_p4)
}
  0x36   : > { %239 = dma.vmem_to_hbm [thread:$0]  (%p443_p11), %s153_s28, 128, %s155_s29, %s140_s17  }
  0x37 PF: > { %s166_s13 = sand.u32 1, %s368_s6   ;;  %p527_p7 = scmp.ge.s32.totalorder %s380_s9, 2 }
  0x38   : > { %s167_s14 = scalar_lea.sflag [#allocation4], %s166_s13 }
  0x39   : > { %p246_p5 = pnand %p527_p7, %p447_p12 }
  0x3b   : > { %p247_p8 = pneg %p246_p5 }
  0x3d   : > { %363 = dma.done.wait (%p247_p8), %s167_s14, 128  }
  0x3e   : > { %365 = vsyncadd (%p247_p8), %s167_s14, 4294967168  ;;  %p14_p10 = scmp.ge.s32.totalorder %s418_s12, 4   ;;  %s528_s6 = smov %s372_s7 }
  0x3f   : > { %s529_s7 = smov %s376_s8  ;;  %s530_s8 = smov %s430_s15 }
  0x40   : > { %s531_s9 = smov %s418_s12  ;;  %16 = sbr.rel (!%p14_p10) target bundleno = 5 (0x5), region = 69 }
  0x45   :  { %173 = vsyncpa [#allocation3], 1 }
  0x46   :  { %175 = vsyncpa [#allocation3 + $0x1], 1 }
  0x47   :  { %176 = vsyncpa [#allocation4], 1 }
  0x48   :  { %178 = vsyncpa [#allocation4 + $0x1], 1 }

</bundles_post_ra>
